<compile_context>
chip_gen: v7x
topology: tpu7x:2x2x1
jax: 0.10.0
libtpu: 0.0.40
codegen_flags: <defaults>
</compile_context>

<pallas_src>
import jax
import jax.numpy as jnp
from jax.experimental import pallas as pl
from jax.experimental.pallas import tpu as pltpu

_LANE = 128
_SUBLANE = 8


def _round_up(x, m):
    return (x + m - 1) // m * m


# --------------------------------------------------------------------------- #
# Kernel
# --------------------------------------------------------------------------- #
def highway_kernel(x_ref, w_ref, b_ref, o_ref):
    # x_ref: (block_m, D)   activations, native dtype (bf16 stays bf16 for the MXU)
    # w_ref: (2, D, tn)     stacked [W_proj; W_gate], out_dim padded to 128 lanes
    # b_ref: (2, 1, tn)     stacked biases
    # o_ref: (block_m, dv)  dv = tn (lane-aligned D) or dv = D (when D < 128-aligned)
    j = pl.program_id(0)            # output-column tile index (outer grid axis)
    dv = o_ref.shape[-1]

    x = x_ref[...]

    # Two MXU matmuls sharing the streamed LHS, f32 accumulation.
    hp = jnp.dot(x, w_ref[0], preferred_element_type=jnp.float32)
    hg = jnp.dot(x, w_ref[1], preferred_element_type=jnp.float32)
    hp = hp + b_ref[0].astype(jnp.float32)
    hg = hg + b_ref[1].astype(jnp.float32)

    proj = jnp.maximum(hp, 0.0)              # relu            (VPU)
    gate = 0.5 * jnp.tanh(0.5 * hg) + 0.5    # sigmoid, one EUP op (tanh)

    # Residual slice of x matching this output-column tile (in_dim == out_dim).
    if dv == x.shape[-1]:                    # single column tile covers all of D
        xs = x
    else:                                    # tn-wide slice (only when D % 128 == 0)
        start = pl.multiple_of(j * dv, _LANE)
        xs = x_ref[:, pl.ds(start, dv)]
    xf = xs.astype(jnp.float32)

    # gate*proj + (1-gate)*x  ==  x + gate*(proj - x)
    out = xf + gate[:, :dv] * (proj[:, :dv] - xf)
    # TODO(synk): training-mode dropout (pltpu.prng_seed + stateful_bernoulli) is
    # intentionally not applied; this kernel is the eval-mode forward (dropout=id).
    o_ref[...] = out.astype(o_ref.dtype)


# --------------------------------------------------------------------------- #
# One-time parameter packing (do NOT call this per forward pass)
# --------------------------------------------------------------------------- #
def highway_prepare_params(w_proj, b_proj, w_gate, b_gate, *, weight_dtype=None):
    """Pack Highway parameters once: pad the output dim to a multiple of 128 lanes
    and stack [proj, gate] -> (2, D, Dp) weights and (2, 1, Dp) biases.
    Optionally cast to `weight_dtype` (e.g. jnp.bfloat16) to halve weight HBM/VMEM.
    Weight layout is (in_dim, out_dim) (transposed from torch.nn.Linear.weight)."""
    D = w_proj.shape[0]
    assert w_proj.shape == (D, D) and w_gate.shape == (D, D)
    Dp = max(_round_up(D, _LANE), _LANE)
    pad = Dp - D

    def pw(w):
        return jnp.pad(w, ((0, 0), (0, pad)))

    def pb(b):
        return jnp.pad(b.reshape(1, D), ((0, 0), (0, pad)))

    w_s = jnp.stack([pw(w_proj), pw(w_gate)], axis=0)   # (2, D, Dp)
    b_s = jnp.stack([pb(b_proj), pb(b_gate)], axis=0)   # (2, 1, Dp)
    if weight_dtype is not None:
        w_s = w_s.astype(weight_dtype)
        b_s = b_s.astype(weight_dtype)
    return w_s, b_s


# --------------------------------------------------------------------------- #
# Tiling heuristic (VMEM-budget driven)
# --------------------------------------------------------------------------- #
def _choose_tiling(M, D, Dp, x_bytes, w_bytes, o_bytes, budget, block_m, block_n):
    lane_aligned = (D % _LANE == 0)

    # ---- output-column tile tn (multiple of 128 dividing Dp).
    if not lane_aligned:
        tn = Dp                            # single column tile; out width stays D
    elif block_n is not None:
        if block_n % _LANE or Dp % block_n:
            raise ValueError("block_n must be a multiple of 128 dividing the padded dim")
        tn = block_n
    else:
        q = Dp // _LANE
        tn = _LANE
        for d in sorted((d for d in range(1, q + 1) if q % d == 0), reverse=True):
            cand = _LANE * d
            bufs = 1 if cand == Dp else 2  # non-constant index map => double-buffered
            if bufs * 2 * D * cand * w_bytes <= 0.45 * budget:
                tn = cand
                break

    w_buffers = 1 if tn == Dp else 2
    out_w = tn if lane_aligned else D
    weight_resident = w_buffers * 2 * (D + 1) * tn * w_bytes

    # ---- row tile: fill the remaining budget (x/out double-buffered + f32 temps).
    per_row = 2 * D * x_bytes + 2 * out_w * o_bytes + 4 * (5 * tn + out_w)
    if block_m is None:
        avail = max(budget - weight_resident, _SUBLANE * per_row)
        block_m = avail // per_row
    block_m = max(_SUBLANE, (int(block_m) // _SUBLANE) * _SUBLANE)
    block_m = min(block_m, 2048, _round_up(M, _SUBLANE))

    est_bytes = int(weight_resident + block_m * per_row)
    return block_m, tn, out_w, w_buffers, est_bytes


# --------------------------------------------------------------------------- #
# Forward pass
# --------------------------------------------------------------------------- #
def highway_apply(x, w_s, b_s, *, vmem_budget_bytes=40 << 20,
                  block_m=None, block_n=None, vmem_limit_bytes=None):
    """Highway forward with parameters pre-packed by highway_prepare_params.

    x: (..., D).  Eval-mode only (dropout is identity).  No per-call weight work
    and no host-side padding of x / the output: x and out are read/written in HBM
    exactly once (plus one x re-read per extra output-column tile for large D)."""
    orig_shape = x.shape
    D = orig_shape[-1]
    if w_s.ndim != 3 or w_s.shape[0] != 2 or w_s.shape[1] != D:
        raise ValueError("w_s/b_s must come from highway_prepare_params for this in_dim")
    Dp = w_s.shape[2]

    x2d = x.reshape(-1, D)
    M = x2d.shape[0]
    out_dtype = x.dtype

    block_m, tn, out_w, w_buffers, est = _choose_tiling(
        M, D, Dp, x2d.dtype.itemsize, w_s.dtype.itemsize,
        jnp.dtype(out_dtype).itemsize, vmem_budget_bytes, block_m, block_n)

    grid_n = Dp // tn
    grid_m = pl.cdiv(M, block_m)

    # Single resident weight copy only when its index map is constant (grid_n == 1).
    w_kw = {"pipeline_mode": pl.Buffered(1)} if w_buffers == 1 else {}

    if vmem_limit_bytes is None:
        vmem_limit_bytes = int(min(max(32 << 20, 1.3 * est + (4 << 20)), 100 << 20))

    cost = pl.CostEstimate(
        flops=int(4 * M * D * Dp),                       # two (M,D)x(D,Dp) matmuls
        transcendentals=int(M * Dp),                     # one tanh per gate element
        bytes_accessed=int(M * D * (x2d.dtype.itemsize + jnp.dtype(out_dtype).itemsize)
                           + (w_s.size + b_s.size) * w_s.dtype.itemsize),
    )

    out = pl.pallas_call(
        highway_kernel,
        out_shape=jax.ShapeDtypeStruct((M, D), out_dtype),
        grid_spec=pltpu.PrefetchScalarGridSpec(
            num_scalar_prefetch=0,
            # Column tiles (j) outer, row tiles (i) inner: weights stream from HBM
            # exactly once; the x row tile is re-read only grid_n times.
            grid=(grid_n, grid_m),
            in_specs=[
                pl.BlockSpec((block_m, D), lambda j, i: (i, 0)),
                pl.BlockSpec((2, D, tn), lambda j, i: (0, 0, j), **w_kw),
                pl.BlockSpec((2, 1, tn), lambda j, i: (0, 0, j), **w_kw),
            ],
            out_specs=pl.BlockSpec((block_m, out_w), lambda j, i: (i, j)),
        ),
        compiler_params=pltpu.CompilerParams(
            dimension_semantics=("parallel", "parallel"),  # independent output tiles
            vmem_limit_bytes=vmem_limit_bytes,
        ),
        cost_estimate=cost,
    )(x2d, w_s, b_s)

    return out.reshape(orig_shape)


def highway_forward(x, w_proj, b_proj, w_gate, b_gate, **kwargs):
    """Convenience one-shot API.  For repeated calls, run highway_prepare_params
    once and call highway_apply, keeping weight packing off the per-call path."""
    w_s, b_s = highway_prepare_params(
        w_proj, b_proj, w_gate, b_gate, weight_dtype=kwargs.pop("weight_dtype", None))
    return highway_apply(x, w_s, b_s, **kwargs)


def highway_reference(x, w_proj, b_proj, w_gate, b_gate):
    proj = jax.nn.relu(x @ w_proj + b_proj)
    gate = jax.nn.sigmoid(x @ w_gate + b_gate)
    return gate * proj + (1.0 - gate) * x


# --------------------------------------------------------------------------- #
# Demo / correctness check
# --------------------------------------------------------------------------- #
if __name__ == "__main__":
    # ---- Config 1: module-sized shapes (batch=2, seq=8, dim=32), f32.
    batch, seq, dim = 2, 8, 32
    kx, kwp, kbp, kwg, kbg = jax.random.split(jax.random.PRNGKey(0), 5)
    x = jax.random.normal(kx, (batch, seq, dim), dtype=jnp.float32)
    scale = 1.0 / jnp.sqrt(jnp.float32(dim))
    w_proj = jax.random.uniform(kwp, (dim, dim), jnp.float32, -scale, scale)
    b_proj = jax.random.uniform(kbp, (dim,), jnp.float32, -scale, scale)
    w_gate = jax.random.uniform(kwg, (dim, dim), jnp.float32, -scale, scale)
    b_gate = jax.random.uniform(kbg, (dim,), jnp.float32, -scale, scale)

    w_s, b_s = highway_prepare_params(w_proj, b_proj, w_gate, b_gate)   # once
    out = jax.block_until_ready(highway_apply(x, w_s, b_s))
    ref = highway_reference(x, w_proj, b_proj, w_gate, b_gate)
    assert out.shape == x.shape
    assert jnp.allclose(out, ref, atol=2e-5, rtol=2e-5), "config-1 mismatch vs reference"

    # ---- Config 2: D multiple of 128; force column tiling (grid_n=2), a multi-row
    #      grid and a partial last row block (96 rows with block_m=72).
    b2, s2, d2 = 4, 24, 256
    k2 = jax.random.split(jax.random.PRNGKey(1), 5)
    x2 = jax.random.normal(k2[0], (b2, s2, d2), dtype=jnp.float32)
    sc2 = 1.0 / jnp.sqrt(jnp.float32(d2))
    wp2 = jax.random.uniform(k2[1], (d2, d2), jnp.float32, -sc2, sc2)
    bp2 = jax.random.uniform(k2[2], (d2,), jnp.float32, -sc2, sc2)
    wg2 = jax.random.uniform(k2[3], (d2, d2), jnp.float32, -sc2, sc2)
    bg2 = jax.random.uniform(k2[4], (d2,), jnp.float32, -sc2, sc2)
    w2_s, b2_s = highway_prepare_params(wp2, bp2, wg2, bg2)
    out2 = jax.block_until_ready(
        highway_apply(x2, w2_s, b2_s, block_n=128, block_m=72))
    ref2 = highway_reference(x2, wp2, bp2, wg2, bg2)
    assert jnp.allclose(out2, ref2, atol=1e-3, rtol=1e-3), "config-2 mismatch vs reference"

    # ---- Config 3: bf16 activations + bf16 weights (halved HBM/VMEM), f32 accumulation.
    w3_s, b3_s = highway_prepare_params(wp2, bp2, wg2, bg2, weight_dtype=jnp.bfloat16)
    xb = x2.astype(jnp.bfloat16)
    out3 = jax.block_until_ready(highway_apply(xb, w3_s, b3_s))
    ref3 = highway_reference(
        xb.astype(jnp.float32),
        wp2.astype(jnp.bfloat16).astype(jnp.float32),
        bp2.astype(jnp.bfloat16).astype(jnp.float32),
        wg2.astype(jnp.bfloat16).astype(jnp.float32),
        bg2.astype(jnp.bfloat16).astype(jnp.float32))
    assert jnp.allclose(out3.astype(jnp.float32), ref3, atol=3e-2, rtol=3e-2), \
        "config-3 (bf16) mismatch vs reference"

    print("KERNEL_OK")
</pallas_src>

<mosaic_0001>
module attributes {stable_mosaic.version = 11 : i64} {
  func.func @highway_kernel(%arg0: i32, %arg1: i32, %arg2: memref<16x32xf32, #tpu.memory_space<vmem>>, %arg3: memref<2x32x128xf32, #tpu.memory_space<vmem>>, %arg4: memref<2x1x128xf32, #tpu.memory_space<vmem>>, %arg5: memref<16x32xf32, #tpu.memory_space<vmem>>) attributes {dimension_semantics = [#tpu.dimension_semantics<parallel>, #tpu.dimension_semantics<parallel>], iteration_bounds = array<i64: 1, 1>, scalar_prefetch = 0 : i64, scratch_operands = 0 : i64, tpu.core_type = #tpu.core_type<tc>, window_params = [{transform_indices = @transform_0, window_bounds = array<i64: 16, 32>}, {pipeline_mode = #tpu.pipeline_mode<synchronous>, transform_indices = @transform_1, window_bounds = array<i64: 2, 32, 128>}, {pipeline_mode = #tpu.pipeline_mode<synchronous>, transform_indices = @transform_2, window_bounds = array<i64: 2, 1, 128>}, {transform_indices = @transform_3, window_bounds = array<i64: 16, 32>}]} {
    %c0 = arith.constant 0 : index
    %c0_0 = arith.constant 0 : index
    %0 = vector.load %arg2[%c0, %c0_0] : memref<16x32xf32, #tpu.memory_space<vmem>>, vector<16x32xf32>
    %c0_1 = arith.constant 0 : index
    %c0_2 = arith.constant 0 : index
    %c0_3 = arith.constant 0 : index
    %1 = vector.load %arg3[%c0_1, %c0_2, %c0_3] : memref<2x32x128xf32, #tpu.memory_space<vmem>>, vector<1x32x128xf32>
    %2 = vector.shape_cast %1 : vector<1x32x128xf32> to vector<32x128xf32>
    %cst = arith.constant dense<0.000000e+00> : vector<16x128xf32>
    %3 = tpu.matmul %0, %2, %cst {dimension_numbers = #tpu.dot_dimension_numbers<[1], [0], [0], [1], [0, 0, 1, 1], [], []>} : vector<16x32xf32>, vector<32x128xf32>, vector<16x128xf32> -> vector<16x128xf32>
    %c1 = arith.constant 1 : index
    %c0_4 = arith.constant 0 : index
    %c0_5 = arith.constant 0 : index
    %4 = vector.load %arg3[%c1, %c0_4, %c0_5] : memref<2x32x128xf32, #tpu.memory_space<vmem>>, vector<1x32x128xf32>
    %5 = vector.shape_cast %4 : vector<1x32x128xf32> to vector<32x128xf32>
    %cst_6 = arith.constant dense<0.000000e+00> : vector<16x128xf32>
    %6 = tpu.matmul %0, %5, %cst_6 {dimension_numbers = #tpu.dot_dimension_numbers<[1], [0], [0], [1], [0, 0, 1, 1], [], []>} : vector<16x32xf32>, vector<32x128xf32>, vector<16x128xf32> -> vector<16x128xf32>
    %c0_7 = arith.constant 0 : index
    %c0_8 = arith.constant 0 : index
    %c0_9 = arith.constant 0 : index
    %7 = vector.load %arg4[%c0_7, %c0_8, %c0_9] : memref<2x1x128xf32, #tpu.memory_space<vmem>>, vector<1x1x128xf32>
    %8 = vector.shape_cast %7 : vector<1x1x128xf32> to vector<1x128xf32>
    %9 = vector.broadcast %8 : vector<1x128xf32> to vector<16x128xf32>
    %10 = arith.addf %3, %9 : vector<16x128xf32>
    %c1_10 = arith.constant 1 : index
    %c0_11 = arith.constant 0 : index
    %c0_12 = arith.constant 0 : index
    %11 = vector.load %arg4[%c1_10, %c0_11, %c0_12] : memref<2x1x128xf32, #tpu.memory_space<vmem>>, vector<1x1x128xf32>
    %12 = vector.shape_cast %11 : vector<1x1x128xf32> to vector<1x128xf32>
    %13 = vector.broadcast %12 : vector<1x128xf32> to vector<16x128xf32>
    %14 = arith.addf %6, %13 : vector<16x128xf32>
    %cst_13 = arith.constant 0.000000e+00 : f32
    %15 = vector.broadcast %cst_13 : f32 to vector<16x128xf32>
    %16 = arith.maximumf %10, %15 : vector<16x128xf32>
    %cst_14 = arith.constant 5.000000e-01 : f32
    %17 = vector.broadcast %cst_14 : f32 to vector<16x128xf32>
    %18 = arith.mulf %17, %14 : vector<16x128xf32>
    %19 = math.tanh %18 : vector<16x128xf32>
    %cst_15 = arith.constant 5.000000e-01 : f32
    %20 = vector.broadcast %cst_15 : f32 to vector<16x128xf32>
    %21 = arith.mulf %20, %19 : vector<16x128xf32>
    %cst_16 = arith.constant 5.000000e-01 : f32
    %22 = vector.broadcast %cst_16 : f32 to vector<16x128xf32>
    %23 = arith.addf %21, %22 : vector<16x128xf32>
    %24 = vector.extract_strided_slice %23 {offsets = [0, 0], sizes = [16, 32], strides = [1, 1]} : vector<16x128xf32> to vector<16x32xf32>
    %25 = vector.extract_strided_slice %16 {offsets = [0, 0], sizes = [16, 32], strides = [1, 1]} : vector<16x128xf32> to vector<16x32xf32>
    %26 = arith.subf %25, %0 : vector<16x32xf32>
    %27 = arith.mulf %24, %26 : vector<16x32xf32>
    %28 = arith.addf %0, %27 : vector<16x32xf32>
    %c0_17 = arith.constant 0 : index
    %c0_18 = arith.constant 0 : index
    %29 = vector.load %arg5[%c0_17, %c0_18] : memref<16x32xf32, #tpu.memory_space<vmem>>, vector<16x32xf32>
    tpu.vector_store %arg5[%c0_17, %c0_18], %28 {strides = array<i32>} : memref<16x32xf32, #tpu.memory_space<vmem>>, vector<16x32xf32>,
    return
  }
  func.func @transform_0(%arg0: i32, %arg1: i32) -> (i32, i32) {
    %c0_i32 = arith.constant 0 : i32
    %c0_i32_0 = arith.constant 0 : i32
    return %arg1, %c0_i32 : i32, i32
  }
  func.func @transform_1(%arg0: i32, %arg1: i32) -> (i32, i32, i32) {
    %c0_i32 = arith.constant 0 : i32
    %c0_i32_0 = arith.constant 0 : i32
    %c0_i32_1 = arith.constant 0 : i32
    return %c0_i32, %c0_i32_0, %arg0 : i32, i32, i32
  }
  func.func @transform_2(%arg0: i32, %arg1: i32) -> (i32, i32, i32) {
    %c0_i32 = arith.constant 0 : i32
    %c0_i32_0 = arith.constant 0 : i32
    %c0_i32_1 = arith.constant 0 : i32
    return %c0_i32, %c0_i32_0, %arg0 : i32, i32, i32
  }
  func.func @transform_3(%arg0: i32, %arg1: i32) -> (i32, i32) {
    %c0_i32 = arith.constant 0 : i32
    return %arg1, %arg0 : i32, i32
  }
}

</mosaic_0001>

<bundles_post_ra>
// kernel: tpu_custom_call.1
= control target key start
LH: loop header
LB: loop body
LE: loop exit
PB: predicated region body
PF: predicated region fallthrough
CT: control target
= control target key end

     0   :  { %8 = vsyncpa [#allocation3], 0  ;;  %s482_s0 = inlined_call_operand.hbm [shape: f32[16,32], index: 0, kind: input, shape index: {}]   ;;  %s483_s1 = inlined_call_operand.hbm [shape: f32[2,32,128], index: 1, kind: input, shape index: {}]   ;;  %s484_s2 = inlined_call_operand.vmem [shape: f32[2,1,128], index: 2, kind: input, shape index: {}]   ;;  %s485_s3 = inlined_call_operand.hbm [shape: f32[16,32], index: 3, kind: output, shape index: {}]  }
   0x1   :  { %9 = vsyncpa [#allocation6], 0 }
   0x2   :  { %10 = vsyncpa [#allocation4], 0  ;;  %s400_s12 = smov [#allocation2]   ;;  %s328_s16 = scalar_lea.hbm %s482_s0, 256 }
   0x3   :  { %s16_s13 = sshll.u32 %s400_s12, 4  ;;  %p329_p0 = scmp.ne.s32.totalorder %s482_s0, %s328_s16  ;;  %s17_s13 = int_to_ptr.vmem [resolvable:$true] %s16_s13 }
   0x4   :  { %p332_p1 = scmp.lt.u32.totalorder %s328_s16, %s482_s0 }
   0x6   :  { %p334_p2 = pnand %p332_p1, %p329_p0 }
   0x8   :  { %337 = shalt.err (!%p334_p2)
}
   0x9   :  { %s338_s21 = scalar_lea.vmem %s17_s13, 256  ;;  %p343_p4 = scmp.lt.s32.totalorder %s17_s13, %s17_s13 }
   0xa   :  { %p339_p3 = scmp.ne.s32.totalorder %s17_s13, %s338_s21  ;;  %p344_p5 = scmp.lt.s32.totalorder %s338_s21, %s338_s21 }
   0xc   :  { %p345_p6 = por %p344_p5, %p343_p4 }
   0xe   :  { %p346_p7 = pnand %p345_p6, %p339_p3 }
  0x10   :  { %349 = shalt.err (!%p346_p7)
}
  0x11   :  { %s401_s22 = smov 128   ;;  %s402_s23 = smov 8  }
  0x12   :  { %22 = dma.hbm_to_vmem [thread:$0]  %s482_s0, 256, %s17_s13, [#allocation3], %s401_s22, %s401_s22, %s402_s23  }
  0x13   :  { %s403_s26 = smov [#allocation5]   ;;  %s350_s30 = scalar_lea.hbm %s483_s1, 1024 }
  0x14   :  { %s28_s27 = sshll.u32 %s403_s26, 4  ;;  %p351_p8 = scmp.ne.s32.totalorder %s483_s1, %s350_s30  ;;  %s29_s27 = int_to_ptr.vmem [resolvable:$true] %s28_s27 }
  0x15   :  { %p354_p9 = scmp.lt.u32.totalorder %s350_s30, %s483_s1 }
  0x17   :  { %p356_p10 = pnand %p354_p9, %p351_p8 }
  0x19   :  { %359 = shalt.err (!%p356_p10)
}
  0x1a   :  { %s360_s8 = scalar_lea.vmem %s29_s27, 1024  ;;  %p365_p12 = scmp.lt.s32.totalorder %s29_s27, %s29_s27 }
  0x1b   :  { %p361_p11 = scmp.ne.s32.totalorder %s29_s27, %s360_s8  ;;  %p366_p13 = scmp.lt.s32.totalorder %s360_s8, %s360_s8 }
  0x1d   :  { %p367_p0 = por %p366_p13, %p365_p12 }
  0x1f   :  { %p368_p1 = pnand %p367_p0, %p361_p11 }
  0x21   :  { %371 = shalt.err (!%p368_p1)
}
  0x22   :  { %34 = dma.hbm_to_vmem [thread:$0]  %s483_s1, 1024, %s29_s27, [#allocation6], %s401_s22, %s401_s22, %s402_s23  }
  0x23   :  { %394 = dma.done.wait [#allocation3], 256  }
  0x24   :  { %395 = vsyncadd [#allocation3], 4294967040 }
  0x25   :  { %396 = dma.done.wait [#allocation6], 1024  }
  0x26   :  { %397 = vsyncadd [#allocation6], 4294966272  ;;  %vm61_vm0 = vcmask 261120   ;;  %v50_v0 = vld [vmem:[#allocation5 + $0x20] sm:$0xff]  ;;  %v51_v1 = vld [vmem:[#allocation5 + $0x28] sm:$0xff]  ;;  %s404_s13 = smov [#allocation7]  }
  0x27   :  { %v52_v2 = vld [vmem:[#allocation5 + $0x30] sm:$0xff]  ;;  %v311_v3 = vpack.c.bf16 %v51_v1, %v50_v0  ;;  %v53_v4 = vld [vmem:[#allocation5 + $0x38] sm:$0xff]  ;;  %v45_v7 = vld [vmem:[#allocation5] sm:$0xff]  ;;  %s249_s14 = sshll.u32 %s404_s13, 4  ;;  %s250_s14 = int_to_ptr.vmem [resolvable:$true] %s249_s14 }
  0x28   :  { %v43_v5 = vld [vmem:[#allocation2] sm:$0xff]  ;;  %v315_v6 = vpack.c.bf16 %v53_v4, %v52_v2  ;;  %v46_v8 = vld [vmem:[#allocation5 + $0x8] sm:$0xff]  ;;  %v48_v11 = vld [vmem:[#allocation5 + $0x18] sm:$0xff]  ;;  %p377_p3 = scmp.lt.s32.totalorder %s250_s14, %s250_s14 }
  0x29   :  { %300 = vmatprep.mubr.msk.f32.mxu1 %vm61_vm0, %v43_v5  ;;  %v47_v9 = vld [vmem:[#allocation5 + $0x10] sm:$0xff]  ;;  %289 = vmatprep.mubr.msk.f32.mxu0 %vm61_vm0, %v43_v5  ;;  %v303_v10 = vpack.c.bf16 %v46_v8, %v45_v7  ;;  %v44_v13 = vld [vmem:[#allocation2 + $0x8] sm:$0xff] }
  0x2a   :  { %312 = vmatprep.subr.bf16.mxu1 %v311_v3  ;;  %v307_v12 = vpack.c.bf16 %v48_v11, %v47_v9  ;;  %v266_v14 = vld [vmem:[%s484_s2 + $0x1] ss:$0 sm:$0xff]  ;;  %v262_v23 = vld [vmem:[%s484_s2] ss:$0 sm:$0xff]  ;;  %s372_s2 = scalar_lea.vmem %s250_s14, 256 }
  0x2b   :  { %314 = vmatpush3.bf16.msra.mxu1 %v311_v3  ;;  %304 = vmatprep.subr.bf16.mxu0 %v303_v10  ;;  %p373_p2 = scmp.ne.s32.totalorder %s250_s14, %s372_s2  ;;  %p378_p4 = scmp.lt.s32.totalorder %s372_s2, %s372_s2 }
  0x2c   :  { %316 = vmatprep.subr.bf16.mxu1 %v315_v6  ;;  %306 = vmatpush3.bf16.msra.mxu0 %v303_v10 }
  0x2d   :  { %308 = vmatprep.subr.bf16.mxu0 %v307_v12  ;;  %p379_p5 = por %p378_p4, %p377_p3 }
  0x2f   :  { %318 = vmatpush3.bf16.msra.mxu1 %v315_v6  ;;  %p380_p6 = pnand %p379_p5, %p373_p2 }
  0x30   :  { %310 = vmatpush3.bf16.msra.mxu0 %v307_v12 }
  0x32   :  { %301 = vmatmul.mubr.msk.f32.vlgmr.msra.gmra.mrb[0].mxu1 %vm61_vm0, %v44_v13 }
  0x33   :  { %290 = vmatmul.mubr.msk.f32.vlgmr.msra.gmra.mrb[0].mxu0 %vm61_vm0, %v44_v13 }
 0x105   :  { %v302_v15 = vpop.f32.mrb[0].mxu1 }
 0x106   :  { %v223_v16 = vadd.f32 %v302_v15, %v266_v14  ;;  %v217_v17 = vpop.f32.mrb[1].mxu1  ;;  %v291_v19 = vpop.f32.mrb[0].mxu0 }
 0x107   :  { %v218_v18 = vadd.f32 %v266_v14, %v217_v17  ;;  %v134_v21 = vpop.f32.mrb[1].mxu0  ;;  %v140_v24 = vadd.f32 %v291_v19, %v262_v23 }
 0x108   :  { %v229_v20 = vmul.f32 0.5, %v223_v16  ;;  %v135_v25 = vadd.f32 %v262_v23, %v134_v21 }
 0x109   :  { %v228_v22 = vmul.f32 0.5, %v218_v18  ;;  %v227_v26 = vmax.f32 %v140_v24, 0.0 }
 0x10a   :  { %324 = vtanh.f32 %v229_v20  ;;  %v226_v27 = vmax.f32 %v135_v25, 0.0 }
 0x10b   :  { %326 = vtanh.f32 %v228_v22  ;;  %v237_v31 = vsub.f32 %v227_v26, %v44_v13 }
 0x10c   :  { %v236_v33 = vsub.f32 %v226_v27, %v43_v5 }
 0x114   :  { %v325_v28 = vpop.eup %324 }
 0x115   :  { %v327_v29 = vpop.eup %326  ;;  %v233_v30 = vmul.f32 0.5, %v325_v28 }
 0x116   :  { %v232_v32 = vmul.f32 0.5, %v327_v29 }
 0x117   :  { %v235_v34 = vadd.f32 0.5, %v233_v30 }
 0x118   :  { %v234_v35 = vadd.f32 0.5, %v232_v32 }
 0x119   :  { %v239_v36 = vmul.f32 %v237_v31, %v235_v34 }
 0x11a   :  { %v238_v37 = vmul.f32 %v236_v33, %v234_v35 }
 0x11b   :  { %v241_v38 = vadd.f32 %v239_v36, %v44_v13 }
 0x11c   :  { %v240_v39 = vadd.f32 %v238_v37, %v43_v5 }
 0x11d   :  { %243 = vst.msk [vmem:[#allocation7 + $0x8] sm:$0xff] %vm61_vm0, %v241_v38 }
 0x11e   :  { %242 = vst.msk [vmem:[#allocation7] sm:$0xff] %vm61_vm0, %v240_v39 }
 0x11f   :  { %383 = shalt.err (!%p380_p6)
}
 0x120   :  { %s384_s17 = scalar_lea.hbm %s485_s3, 256 }
 0x121   :  { %p385_p7 = scmp.ne.s32.totalorder %s485_s3, %s384_s17  ;;  %p388_p8 = scmp.lt.u32.totalorder %s384_s17, %s485_s3 }
 0x123   :  { %p390_p9 = pnand %p388_p8, %p385_p7 }
 0x125   :  { %393 = shalt.err (!%p390_p9)
}
 0x126   :  { %255 = dma.vmem_to_hbm [thread:$0]  %s250_s14, 256, %s485_s3, [#allocation4], %s401_s22, %s401_s22, %s402_s23  }
 0x127   :  { %398 = dma.done.wait [#allocation4], 256  }
 0x128   :  { %399 = vsyncadd [#allocation4], 4294967040 }
 0x129   :  { %259 = vsyncpa [#allocation3], 1 }
 0x12a   :  { %260 = vsyncpa [#allocation6], 1 }
 0x12b   :  { %261 = vsyncpa [#allocation4], 1 }

</bundles_post_ra>
